<compile_context>
chip_gen: v7x
topology: tpu7x:2x2x1
jax: 0.10.0
libtpu: 0.0.40
codegen_flags: <defaults>
</compile_context>

<pallas_src>
import functools

import jax
import jax.numpy as jnp
from jax.experimental import pallas as pl
from jax.experimental.pallas import tpu as pltpu


LANE = 128                            # lane width; channel dims padded to this
VMEM_LIMIT = 48 * 1024 * 1024         # scoped VMEM request (fits v7x 64 MiB/TC)
VMEM_BUDGET = 40 * 1024 * 1024        # tile-sizing budget (headroom under limit)


def _round_up(x, m):
    return (x + m - 1) // m * m


def _pick_row_tile(n_pad, pref):
    """Largest multiple of LANE that divides n_pad and is <= pref."""
    t = min(pref, n_pad)
    t = max((t // LANE) * LANE, LANE)
    while t > LANE and n_pad % t != 0:
        t -= LANE
    return t


def _pick_aggr_tile(n_pad, c_in_pad, c_out_pad, out_bytes):
    """Row tile for the aggregation kernel, gated by a per-TC VMEM budget."""
    def usage(tm):
        a = 2 * tm * n_pad * 2              # A row-stripe, double-buffered bf16
        h = 2 * n_pad * c_out_pad * 2       # H resident (buffer pair), bf16
        x = 2 * tm * c_in_pad * 2           # X row tile, bf16
        w = 2 * (c_in_pad * c_out_pad * 2 + c_out_pad * 4)  # W_root + bias
        o = 2 * tm * c_out_pad * out_bytes  # output tile
        return a + h + x + w + o

    t = _pick_row_tile(n_pad, 512)
    while t > LANE and usage(t) > VMEM_BUDGET:
        nt = t - LANE
        while nt > LANE and n_pad % nt != 0:
            nt -= LANE
        t = nt
    # TODO(synk): if even TM=LANE overflows the budget (very large N), fall
    # back to a k-tiled reduction over the adjacency columns.
    return t


# ----------------------------- Pallas kernels ------------------------------ #

def _sage_feat_kernel(x_ref, wl_ref, h_ref):
    """H = X @ W_neigh on one row tile.

    x_ref : [TMF, Cin_pad]      bf16 node features
    wl_ref: [Cin_pad, Cout_pad] bf16 neighbor weight (resident)
    h_ref : [TMF, Cout_pad]     bf16 out
    """
    h = jnp.dot(x_ref[...], wl_ref[...], preferred_element_type=jnp.float32)
    h_ref[...] = h.astype(h_ref.dtype)


def _sage_aggr_kernel(a_ref, h_ref, x_ref, wr_ref, b_ref, o_ref, *, apply_relu):
    """out = A_stripe @ H + X_tile @ W_root + b (+ ReLU), f32 accumulation.

    a_ref : [TM, N_pad]         bf16 row-normalized adjacency stripe
    h_ref : [N_pad, Cout_pad]   bf16 transformed neighbor features (resident)
    x_ref : [TM, Cin_pad]       bf16 node features for the self term
    wr_ref: [Cin_pad, Cout_pad] bf16 root weight (resident)
    b_ref : [1, Cout_pad]       f32 bias (resident)
    o_ref : [TM, Cout_pad]      bf16 (hidden layers) or f32 (last layer)
    """
    agg = jnp.dot(a_ref[...], h_ref[...], preferred_element_type=jnp.float32)
    self_t = jnp.dot(x_ref[...], wr_ref[...], preferred_element_type=jnp.float32)
    out = agg + self_t + b_ref[...]
    if apply_relu:
        out = jnp.maximum(out, 0.0)
    o_ref[...] = out.astype(o_ref.dtype)


# ------------------------------ Layer wrapper ------------------------------ #

def sage_conv_layer(adj_bf16, x_pad, w_l_pad, w_r_pad, b_pad, apply_relu,
                    out_dtype):
    """One SAGEConv layer on padded operands.

    adj_bf16: [N_pad, N_pad]        bf16 row-normalized weighted adjacency
    x_pad   : [N_pad, Cin_pad]      bf16 node features (zero-padded)
    w_l_pad : [Cin_pad, Cout_pad]   bf16 neighbor weight (zero-padded)
    w_r_pad : [Cin_pad, Cout_pad]   bf16 root weight     (zero-padded)
    b_pad   : [1, Cout_pad]         f32 bias (zero-padded)
    returns : [N_pad, Cout_pad] in out_dtype
    """
    n_pad, c_in_pad = x_pad.shape
    c_out_pad = w_l_pad.shape[1]

    # --- feature transform H = X @ W_neigh, large row tiles ---------------- #
    tm_feat = _pick_row_tile(n_pad, 1024)
    h = pl.pallas_call(
        _sage_feat_kernel,
        out_shape=jax.ShapeDtypeStruct((n_pad, c_out_pad), jnp.bfloat16),
        grid=(n_pad // tm_feat,),
        in_specs=[
            pl.BlockSpec((tm_feat, c_in_pad), lambda i: (i, 0)),
            pl.BlockSpec((c_in_pad, c_out_pad), lambda i: (0, 0)),
        ],
        out_specs=pl.BlockSpec((tm_feat, c_out_pad), lambda i: (i, 0)),
        compiler_params=pltpu.CompilerParams(
            dimension_semantics=("parallel",),
            vmem_limit_bytes=VMEM_LIMIT,
        ),
    )(x_pad, w_l_pad)

    # --- aggregation out = A @ H + X @ W_root + b (+ ReLU) ----------------- #
    out_bytes = jnp.dtype(out_dtype).itemsize
    tm = _pick_aggr_tile(n_pad, c_in_pad, c_out_pad, out_bytes)
    out = pl.pallas_call(
        functools.partial(_sage_aggr_kernel, apply_relu=apply_relu),
        out_shape=jax.ShapeDtypeStruct((n_pad, c_out_pad), out_dtype),
        grid=(n_pad // tm,),
        in_specs=[
            pl.BlockSpec((tm, n_pad), lambda i: (i, 0)),            # A stripe
            pl.BlockSpec((n_pad, c_out_pad), lambda i: (0, 0)),     # H resident
            pl.BlockSpec((tm, c_in_pad), lambda i: (i, 0)),         # X tile
            pl.BlockSpec((c_in_pad, c_out_pad), lambda i: (0, 0)),  # W_root
            pl.BlockSpec((1, c_out_pad), lambda i: (0, 0)),         # bias
        ],
        out_specs=pl.BlockSpec((tm, c_out_pad), lambda i: (i, 0)),
        compiler_params=pltpu.CompilerParams(
            dimension_semantics=("parallel",),
            vmem_limit_bytes=VMEM_LIMIT,
        ),
    )(adj_bf16, h, x_pad, w_r_pad, b_pad)
    return out


# -------------------------------- SAGE model ------------------------------- #

def make_sage_params(in_channels, hidden_channels, out_channels,
                     num_layers, key):
    """Deterministic init mirroring SAGE's layer structure (unpadded)."""
    dims = ([in_channels]
            + [hidden_channels] * (num_layers - 1)
            + [out_channels])
    params = []
    for li in range(num_layers):
        c_in, c_out = dims[li], dims[li + 1]
        key, k_l, k_r, k_b = jax.random.split(key, 4)
        scale = jnp.sqrt(2.0 / (c_in + c_out)).astype(jnp.float32)
        w_l = jax.random.normal(k_l, (c_in, c_out), dtype=jnp.float32) * scale
        w_r = jax.random.normal(k_r, (c_in, c_out), dtype=jnp.float32) * scale
        b = jax.random.normal(k_b, (c_out,), dtype=jnp.float32) * 0.01
        params.append((w_l, w_r, b))
    return params


def sage_forward(x, edge_index, edge_weight, node_type, params,
                 dropout=0.0, training=False):
    """SAGE.forward: (num_layers-1) x [conv -> relu -> dropout] -> conv."""
    del node_type  # accepted but unused by the reference forward
    n, c_in = x.shape
    n_pad = _round_up(n, LANE)

    # Glue: edge list -> dense row-normalized weighted adjacency (mean aggr).
    src = edge_index[0]
    dst = edge_index[1]
    adj = jnp.zeros((n_pad, n_pad), dtype=jnp.float32).at[dst, src].add(
        edge_weight.astype(jnp.float32))
    deg = jnp.sum(adj, axis=1, keepdims=True)
    adj_bf16 = (adj / jnp.maximum(deg, 1e-12)).astype(jnp.bfloat16)

    # Zero-pad features to lane-dense, tile-aligned shape; bf16 for the MXU.
    c_in_pad = _round_up(c_in, LANE)
    h = jnp.pad(x.astype(jnp.float32),
                ((0, n_pad - n), (0, c_in_pad - c_in))).astype(jnp.bfloat16)

    num_layers = len(params)
    for li, (w_l, w_r, b) in enumerate(params):
        is_last = li == num_layers - 1
        c_i, c_o = w_l.shape
        ci_pad, co_pad = _round_up(c_i, LANE), _round_up(c_o, LANE)
        w_l_pad = jnp.pad(
            w_l, ((0, ci_pad - c_i), (0, co_pad - c_o))).astype(jnp.bfloat16)
        w_r_pad = jnp.pad(
            w_r, ((0, ci_pad - c_i), (0, co_pad - c_o))).astype(jnp.bfloat16)
        b_pad = jnp.pad(b, (0, co_pad - c_o)).reshape(1, co_pad).astype(
            jnp.float32)
        out_dtype = jnp.float32 if is_last else jnp.bfloat16
        h = sage_conv_layer(adj_bf16, h, w_l_pad, w_r_pad, b_pad,
                            apply_relu=not is_last, out_dtype=out_dtype)
        # TODO(synk): dropout with p=0.0 / eval mode is identity; a training
        # implementation would use pltpu.prng_random_bits inside the kernel.

    c_out = params[-1][0].shape[1]
    return h[:n, :c_out].astype(jnp.float32)


# --------------------------------- Driver ----------------------------------- #

if __name__ == "__main__":
    key = jax.random.PRNGKey(0)

    # Small, module-consistent shapes.
    num_nodes = 64
    in_channels = 16
    hidden_channels = 32
    out_channels = 8
    num_layers = 2
    num_edges = 256
    num_node_types = 3

    k_x, k_src, k_dst, k_ew, k_nt, k_p = jax.random.split(key, 6)
    x = jax.random.normal(k_x, (num_nodes, in_channels), dtype=jnp.float32)
    src = jax.random.randint(k_src, (num_edges,), 0, num_nodes, dtype=jnp.int32)
    dst = jax.random.randint(k_dst, (num_edges,), 0, num_nodes, dtype=jnp.int32)
    edge_index = jnp.stack([src, dst], axis=0)               # [2, E]
    edge_weight = jax.random.uniform(k_ew, (num_edges,), dtype=jnp.float32)
    node_type = jax.random.randint(k_nt, (num_nodes,), 0, num_node_types,
                                   dtype=jnp.int32)

    params = make_sage_params(in_channels, hidden_channels, out_channels,
                              num_layers, k_p)

    out = sage_forward(x, edge_index, edge_weight, node_type, params,
                       dropout=0.0, training=False)
    out = jax.block_until_ready(out)
    assert out.shape == (num_nodes, out_channels)
    assert jnp.all(jnp.isfinite(out))
    print("KERNEL_OK")
</pallas_src>

<mosaic_0001>
module attributes {stable_mosaic.version = 11 : i64} {
  func.func @_sage_feat_kernel(%arg0: i32, %arg1: memref<128x128xbf16, #tpu.memory_space<vmem>>, %arg2: memref<128x128xbf16, #tpu.memory_space<vmem>>, %arg3: memref<128x128xbf16, #tpu.memory_space<vmem>>) attributes {dimension_semantics = [#tpu.dimension_semantics<parallel>], iteration_bounds = array<i64: 1>, scalar_prefetch = 0 : i64, scratch_operands = 0 : i64, tpu.core_type = #tpu.core_type<tc>, window_params = [{transform_indices = @transform_0, window_bounds = array<i64: 128, 128>}, {pipeline_mode = #tpu.pipeline_mode<synchronous>, transform_indices = @transform_1, window_bounds = array<i64: 128, 128>}, {transform_indices = @transform_2, window_bounds = array<i64: 128, 128>}]} {
    %c0 = arith.constant 0 : index
    %c0_0 = arith.constant 0 : index
    %0 = vector.load %arg1[%c0, %c0_0] : memref<128x128xbf16, #tpu.memory_space<vmem>>, vector<128x128xbf16>
    %c0_1 = arith.constant 0 : index
    %c0_2 = arith.constant 0 : index
    %1 = vector.load %arg2[%c0_1, %c0_2] : memref<128x128xbf16, #tpu.memory_space<vmem>>, vector<128x128xbf16>
    %cst = arith.constant dense<0.000000e+00> : vector<128x128xf32>
    %2 = tpu.matmul %0, %1, %cst {dimension_numbers = #tpu.dot_dimension_numbers<[1], [0], [0], [1], [0, 0, 1, 1], [], []>} : vector<128x128xbf16>, vector<128x128xbf16>, vector<128x128xf32> -> vector<128x128xf32>
    %3 = arith.truncf %2 : vector<128x128xf32> to vector<128x128xbf16>
    %c0_3 = arith.constant 0 : index
    %c0_4 = arith.constant 0 : index
    %4 = vector.load %arg3[%c0_3, %c0_4] : memref<128x128xbf16, #tpu.memory_space<vmem>>, vector<128x128xbf16>
    tpu.vector_store %arg3[%c0_3, %c0_4], %3 {strides = array<i32>} : memref<128x128xbf16, #tpu.memory_space<vmem>>, vector<128x128xbf16>,
    return
  }
  func.func @transform_0(%arg0: i32) -> (i32, i32) {
    %c0_i32 = arith.constant 0 : i32
    %c0_i32_0 = arith.constant 0 : i32
    return %arg0, %c0_i32 : i32, i32
  }
  func.func @transform_1(%arg0: i32) -> (i32, i32) {
    %c0_i32 = arith.constant 0 : i32
    %c0_i32_0 = arith.constant 0 : i32
    %c0_i32_1 = arith.constant 0 : i32
    return %c0_i32, %c0_i32_0 : i32, i32
  }
  func.func @transform_2(%arg0: i32) -> (i32, i32) {
    %c0_i32 = arith.constant 0 : i32
    %c0_i32_0 = arith.constant 0 : i32
    return %arg0, %c0_i32 : i32, i32
  }
}

</mosaic_0001>

<bundles_post_ra>
// kernel: tpu_custom_call.1
= control target key start
LH: loop header
LB: loop body
LE: loop exit
PB: predicated region body
PF: predicated region fallthrough
CT: control target
= control target key end

     0   :  { %7 = vsyncpa [#allocation3], 0  ;;  %s681_s0 = inlined_call_operand.hbm [shape: bf16[128,128], index: 0, kind: input, shape index: {}]   ;;  %s682_s1 = inlined_call_operand.hbm [shape: bf16[128,128], index: 1, kind: input, shape index: {}]   ;;  %s683_s2 = inlined_call_operand.hbm [shape: bf16[128,128], index: 2, kind: output, shape index: {}]  }
   0x1   :  { %8 = vsyncpa [#allocation6], 0 }
   0x2   :  { %9 = vsyncpa [#allocation4], 0  ;;  %s616_s9 = smov [#allocation2]   ;;  %s544_s13 = scalar_lea.hbm %s681_s0, 1024 }
   0x3   :  { %s15_s10 = sshll.u32 %s616_s9, 4  ;;  %p545_p0 = scmp.ne.s32.totalorder %s681_s0, %s544_s13  ;;  %s16_s10 = int_to_ptr.vmem [resolvable:$true] %s15_s10 }
   0x4   :  { %p548_p1 = scmp.lt.u32.totalorder %s544_s13, %s681_s0 }
   0x6   :  { %p550_p2 = pnand %p548_p1, %p545_p0 }
   0x8   :  { %553 = shalt.err (!%p550_p2)
}
   0x9   :  { %s554_s18 = scalar_lea.vmem %s16_s10, 1024  ;;  %p559_p4 = scmp.lt.s32.totalorder %s16_s10, %s16_s10 }
   0xa   :  { %p555_p3 = scmp.ne.s32.totalorder %s16_s10, %s554_s18  ;;  %p560_p5 = scmp.lt.s32.totalorder %s554_s18, %s554_s18 }
   0xc   :  { %p561_p6 = por %p560_p5, %p559_p4 }
   0xe   :  { %p562_p7 = pnand %p561_p6, %p555_p3 }
  0x10   :  { %565 = shalt.err (!%p562_p7)
}
  0x11   :  { %s617_s19 = smov 64   ;;  %s618_s20 = smov 4  }
  0x12   :  { %21 = dma.hbm_to_vmem [thread:$0]  %s681_s0, 1024, %s16_s10, [#allocation3], %s617_s19, %s617_s19, %s618_s20  }
  0x13   :  { %s619_s23 = smov [#allocation5]   ;;  %s566_s27 = scalar_lea.hbm %s682_s1, 1024 }
  0x14   :  { %s27_s24 = sshll.u32 %s619_s23, 4  ;;  %p567_p8 = scmp.ne.s32.totalorder %s682_s1, %s566_s27  ;;  %s28_s24 = int_to_ptr.vmem [resolvable:$true] %s27_s24 }
  0x15   :  { %p570_p9 = scmp.lt.u32.totalorder %s566_s27, %s682_s1 }
  0x17   :  { %p572_p10 = pnand %p570_p9, %p567_p8 }
  0x19   :  { %575 = shalt.err (!%p572_p10)
}
  0x1a   :  { %s576_s4 = scalar_lea.vmem %s28_s24, 1024  ;;  %p581_p12 = scmp.lt.s32.totalorder %s28_s24, %s28_s24 }
  0x1b   :  { %p577_p11 = scmp.ne.s32.totalorder %s28_s24, %s576_s4  ;;  %p582_p13 = scmp.lt.s32.totalorder %s576_s4, %s576_s4 }
  0x1d   :  { %p583_p0 = por %p582_p13, %p581_p12 }
  0x1f   :  { %p584_p1 = pnand %p583_p0, %p577_p11 }
  0x21   :  { %587 = shalt.err (!%p584_p1)
}
  0x22   :  { %33 = dma.hbm_to_vmem [thread:$0]  %s682_s1, 1024, %s28_s24, [#allocation6], %s617_s19, %s617_s19, %s618_s20  }
  0x23   :  { %610 = dma.done.wait [#allocation3], 1024  }
  0x24   :  { %611 = vsyncadd [#allocation3], 4294966272 }
  0x25   :  { %612 = dma.done.wait [#allocation6], 1024  }
  0x26   :  { %613 = vsyncadd [#allocation6], 4294966272  ;;  %v528_v0 = vld [vmem:[#allocation5] sm:$0xff]   ;;  %v529_v1 = vld [vmem:[#allocation5 + $0x8] sm:$0xff]   ;;  %s620_s1 = smov [#allocation7]  }
  0x27   :  { %475 = vmatprep.subr.bf16.mxu0 %v528_v0  ;;  %507 = vmatprep.subr.bf16.mxu1 %v528_v0  ;;  %v530_v2 = vld [vmem:[#allocation5 + $0x10] sm:$0xff]   ;;  %v531_v3 = vld [vmem:[#allocation5 + $0x18] sm:$0xff]   ;;  %v536_v4 = vld [vmem:[#allocation2] sm:$0xff]   ;;  %s351_s6 = sshll.u32 %s620_s1, 4  ;;  %s352_s6 = int_to_ptr.vmem [resolvable:$true] %s351_s6 }
  0x28   :  { %476 = vmatpush3.bf16.msra.mxu0 %v528_v0  ;;  %515 = vmatpush3.bf16.msra.mxu1 %v528_v0  ;;  %v537_v5 = vld [vmem:[#allocation2 + $0x20] sm:$0xff]   ;;  %v533_v7 = vld [vmem:[#allocation5 + $0x28] sm:$0xff]   ;;  %v534_v8 = vld [vmem:[#allocation5 + $0x30] sm:$0xff]   ;;  %s588_s7 = scalar_lea.vmem %s352_s6, 1024  ;;  %p593_p3 = scmp.lt.s32.totalorder %s352_s6, %s352_s6 }
  0x29   :  { %477 = vmatprep.subr.bf16.mxu0 %v529_v1  ;;  %508 = vmatprep.subr.bf16.mxu1 %v529_v1  ;;  %v532_v6 = vld [vmem:[#allocation5 + $0x20] sm:$0xff]   ;;  %v535_v9 = vld [vmem:[#allocation5 + $0x38] sm:$0xff]   ;;  %v538_v10 = vld [vmem:[#allocation2 + $0x8] sm:$0xff]   ;;  %p589_p2 = scmp.ne.s32.totalorder %s352_s6, %s588_s7  ;;  %p594_p4 = scmp.lt.s32.totalorder %s588_s7, %s588_s7 }
  0x2a   :  { %491 = vmatprep.mubr.bf16.mxu0 %v536_v4  ;;  %499 = vmatprep.mubr.bf16.mxu1 %v537_v5  ;;  %v539_v11 = vld [vmem:[#allocation2 + $0x28] sm:$0xff]   ;;  %v540_v12 = vld [vmem:[#allocation2 + $0x10] sm:$0xff]   ;;  %v542_v14 = vld [vmem:[#allocation2 + $0x18] sm:$0xff]  }
  0x2b   :  { %v541_v13 = vld [vmem:[#allocation2 + $0x30] sm:$0xff]   ;;  %v543_v15 = vld [vmem:[#allocation2 + $0x38] sm:$0xff]   ;;  %p595_p5 = por %p594_p4, %p593_p3 }
  0x2c   :  { %478 = vmatpush3.bf16.msra.mxu0 %v529_v1  ;;  %516 = vmatpush3.bf16.msra.mxu1 %v529_v1 }
  0x2d   :  { %479 = vmatprep.subr.bf16.mxu0 %v530_v2  ;;  %509 = vmatprep.subr.bf16.mxu1 %v530_v2  ;;  %p596_p6 = pnand %p595_p5, %p589_p2 }
  0x30   :  { %480 = vmatpush3.bf16.msra.mxu0 %v530_v2  ;;  %517 = vmatpush3.bf16.msra.mxu1 %v530_v2 }
  0x31   :  { %481 = vmatprep.subr.bf16.mxu0 %v531_v3  ;;  %510 = vmatprep.subr.bf16.mxu1 %v531_v3 }
  0x34   :  { %482 = vmatpush3.bf16.msra.mxu0 %v531_v3  ;;  %518 = vmatpush3.bf16.msra.mxu1 %v531_v3 }
  0x35   :  { %483 = vmatprep.subr.bf16.mxu0 %v532_v6  ;;  %511 = vmatprep.subr.bf16.mxu1 %v532_v6 }
  0x38   :  { %484 = vmatpush3.bf16.msra.mxu0 %v532_v6  ;;  %519 = vmatpush3.bf16.msra.mxu1 %v532_v6 }
  0x39   :  { %485 = vmatprep.subr.bf16.mxu0 %v533_v7  ;;  %512 = vmatprep.subr.bf16.mxu1 %v533_v7 }
  0x3c   :  { %486 = vmatpush3.bf16.msra.mxu0 %v533_v7  ;;  %520 = vmatpush3.bf16.msra.mxu1 %v533_v7 }
  0x3d   :  { %487 = vmatprep.subr.bf16.mxu0 %v534_v8  ;;  %513 = vmatprep.subr.bf16.mxu1 %v534_v8 }
  0x40   :  { %488 = vmatpush3.bf16.msra.mxu0 %v534_v8  ;;  %521 = vmatpush3.bf16.msra.mxu1 %v534_v8 }
  0x41   :  { %489 = vmatprep.subr.bf16.mxu0 %v535_v9  ;;  %514 = vmatprep.subr.bf16.mxu1 %v535_v9 }
  0x44   :  { %490 = vmatpush3.bf16.msra.mxu0 %v535_v9  ;;  %522 = vmatpush3.bf16.msra.mxu1 %v535_v9 }
  0x47   :  { %492 = vmatmul.mubr.bf16.vlgmr.msra.gmra.mrb[0].mxu0 %v538_v10  ;;  %500 = vmatmul.mubr.bf16.vlgmr.msra.gmra.mrb[0].mxu1 %v539_v11 }
  0x48   :  { %495 = vmatprep.mubr.bf16.mxu0 %v540_v12  ;;  %503 = vmatprep.mubr.bf16.mxu1 %v541_v13 }
  0x4f   :  { %496 = vmatmul.mubr.bf16.gmra.mrb[4].mxu0 %v542_v14  ;;  %504 = vmatmul.mubr.bf16.gmra.mrb[4].mxu1 %v543_v15 }
 0x11a   :  { %v493_v16 = vpop.f32.mrb[0].mxu0  ;;  %v501_v17 = vpop.f32.mrb[0].mxu1 }
 0x11b   :  { %v203_v18 = vpop.f32.mrb[1].mxu0  ;;  %v235_v19 = vpop.f32.mrb[1].mxu1 }
 0x11c   :  { %v494_v20 = vpop.f32.mrb[2].mxu0  ;;  %v502_v21 = vpop.f32.mrb[2].mxu1 }
 0x11d   :  { %v420_v22 = vpack.c.bf16 %v494_v20, %v493_v16  ;;  %v440_v23 = vpack.c.bf16 %v502_v21, %v501_v17  ;;  %v206_v24 = vpop.f32.mrb[3].mxu0  ;;  %v238_v25 = vpop.f32.mrb[3].mxu1 }
 0x11e   :  { %v415_v26 = vpack.c.bf16 %v206_v24, %v203_v18  ;;  %v435_v27 = vpack.c.bf16 %v238_v25, %v235_v19 }
 0x11f   :  { %452 = vst [vmem:[#allocation7 + $0x8] sm:$0xff] %v420_v22   ;;  %456 = vst [vmem:[#allocation7 + $0x28] sm:$0xff] %v440_v23  }
 0x120   :  { %416 = vst [vmem:[#allocation7] sm:$0xff] %v415_v26   ;;  %455 = vst [vmem:[#allocation7 + $0x20] sm:$0xff] %v435_v27  }
 0x122   :  { %v497_v28 = vpop.f32.mrb[4].mxu0  ;;  %v505_v29 = vpop.f32.mrb[4].mxu1 }
 0x123   :  { %v219_v30 = vpop.f32.mrb[5].mxu0  ;;  %v251_v31 = vpop.f32.mrb[5].mxu1 }
 0x124   :  { %v498_v32 = vpop.f32.mrb[6].mxu0  ;;  %v506_v33 = vpop.f32.mrb[6].mxu1 }
 0x125   :  { %v430_v34 = vpack.c.bf16 %v498_v32, %v497_v28  ;;  %v450_v35 = vpack.c.bf16 %v506_v33, %v505_v29  ;;  %v222_v36 = vpop.f32.mrb[7].mxu0  ;;  %v254_v37 = vpop.f32.mrb[7].mxu1 }
 0x126   :  { %v425_v38 = vpack.c.bf16 %v222_v36, %v219_v30  ;;  %v445_v39 = vpack.c.bf16 %v254_v37, %v251_v31 }
 0x127   :  { %454 = vst [vmem:[#allocation7 + $0x18] sm:$0xff] %v430_v34   ;;  %458 = vst [vmem:[#allocation7 + $0x38] sm:$0xff] %v450_v35  }
 0x128   :  { %453 = vst [vmem:[#allocation7 + $0x10] sm:$0xff] %v425_v38   ;;  %457 = vst [vmem:[#allocation7 + $0x30] sm:$0xff] %v445_v39  }
 0x129   :  { %599 = shalt.err (!%p596_p6)
}
 0x12a   :  { %s600_s10 = scalar_lea.hbm %s683_s2, 1024 }
 0x12b   :  { %p601_p7 = scmp.ne.s32.totalorder %s683_s2, %s600_s10  ;;  %p604_p8 = scmp.lt.u32.totalorder %s600_s10, %s683_s2 }
 0x12d   :  { %p606_p9 = pnand %p604_p8, %p601_p7 }
 0x12f   :  { %609 = shalt.err (!%p606_p9)
}
 0x130   :  { %357 = dma.vmem_to_hbm [thread:$0]  %s352_s6, 1024, %s683_s2, [#allocation4], %s617_s19, %s617_s19, %s618_s20  }
 0x131   :  { %614 = dma.done.wait [#allocation4], 1024  }
 0x132   :  { %615 = vsyncadd [#allocation4], 4294966272 }
 0x133   :  { %361 = vsyncpa [#allocation3], 1 }
 0x134   :  { %362 = vsyncpa [#allocation6], 1 }
 0x135   :  { %363 = vsyncpa [#allocation4], 1 }

</bundles_post_ra>
